<compile_context>
chip_gen: v7x
topology: tpu7x:2x2x1
jax: 0.10.0
libtpu: 0.0.40
codegen_flags: <defaults>
</compile_context>

<pallas_src>
import functools

import jax
import jax.numpy as jnp
from jax.experimental import pallas as pl
from jax.experimental.pallas import tpu as pltpu


def _classifier_kernel(x_ref, w_ref, b_ref, o_ref, *, lane_groups, group_dim):
    # x_ref: (Bt, Dp) VMEM, Dp = lane_groups * group_dim
    # w_ref: (1, Dp)  VMEM (weight row, repeated per lane group)
    # b_ref: (1,)     SMEM scalar bias
    # o_ref: (Bt, lane_groups) VMEM
    x = x_ref[...].astype(jnp.float32)   # f32 accumulation even for bf16 inputs
    w = w_ref[...].astype(jnp.float32)
    prod = x * w                         # VPU elementwise, sublane broadcast of w

    if lane_groups == 1:
        logits = jnp.sum(prod, axis=-1, keepdims=True)            # (Bt, 1)
    else:
        # Segment-reduce each D-lane group -> lane_groups logits per row.
        cols = [
            jnp.sum(prod[:, c * group_dim:(c + 1) * group_dim],
                    axis=-1, keepdims=True)
            for c in range(lane_groups)
        ]
        logits = jnp.concatenate(cols, axis=-1)                    # (Bt, k)

    logits = logits + b_ref[0]                                     # scalar bias (SMEM)
    o_ref[...] = jax.nn.sigmoid(logits).astype(o_ref.dtype)


def _vmem_budget_bytes():
    """Per-generation VMEM budget for the pipelined buffers."""
    try:
        vmem = getattr(pltpu.get_tpu_info(), "vmem_capacity_bytes", None)
        if vmem is not None and vmem >= (96 << 20):
            return 40 << 20        # v5e / v6e: 128 MiB physical VMEM
    except Exception:
        pass
    return 24 << 20                # v7x (64 MiB VMEM) or unknown: conservative


def _choose_block_rows(batch, d_vmem_lanes, elem):
    """Rows per grid step: sized so 2 x-buffers + 2 lane-padded out-buffers fit
    the generation's VMEM budget, a multiple of 8 sublanes, and clamped so
    there are >= 2 grid steps whenever there is enough data (DMA/compute
    overlap + work for both v7x TensorCores on the 'parallel' batch axis)."""
    per_row = 2 * (d_vmem_lanes + 128) * elem
    rows = max(8, (_vmem_budget_bytes() // per_row) // 8 * 8)
    if batch >= 16 and batch * d_vmem_lanes * elem > (2 << 20):
        half = -(-batch // 2)            # ceil(batch / 2)
        half = -(-half // 8) * 8         # rounded up to 8 sublanes
        rows = min(rows, max(8, half))
    return rows


def classifier_forward(x, w, b, *, block_rows=None, pack_lanes=True):
    """x: (B, D), w: (D, 1) or (1, D), b: (1,) -> (B, 1) scores (x.dtype)."""
    B, D = x.shape
    dtype = x.dtype
    elem = int(jnp.dtype(dtype).itemsize)

    # Lane packing for small feature dims (D < 128): view x as (B/k, k*D).
    k = 1
    if pack_lanes and D < 128 and (128 % D == 0):
        k_cand = 128 // D
        if B % k_cand == 0:
            k = k_cand
    Bp, Dp = B // k, D * k

    w_row = jnp.reshape(w, (1, D)).astype(dtype)
    if k > 1:
        w_row = jnp.tile(w_row, (1, k))           # (1, k*D)
        x = jnp.reshape(x, (Bp, Dp))              # row-major: free reshape
    b_s = jnp.reshape(b, (1,)).astype(jnp.float32)

    Dp_vmem = -(-Dp // 128) * 128                 # lanes pad to 128 in VMEM
    if block_rows is None:
        rows = _choose_block_rows(Bp, Dp_vmem, elem)
    else:
        rows = max(8, (int(block_rows) // 8) * 8)
    # Bt must be a multiple of 8 sublanes OR equal the full batch dim.
    Bt = Bp if rows >= Bp else rows
    n_tiles = pl.cdiv(Bp, Bt)                     # ragged last block is masked

    # Accurate (8,128)-padded VMEM accounting for the requested limit.
    Bt_pad = -(-Bt // 8) * 8
    vmem_needed = (2 * Bt_pad * Dp_vmem * elem     # double-buffered x tiles
                   + 2 * Bt_pad * 128 * elem       # double-buffered out tiles (lane padded)
                   + 2 * 8 * Dp_vmem * elem        # resident weight row
                   + (1 << 20))                    # scratch / regalloc headroom
    vmem_limit = int(max(vmem_needed, 16 << 20))

    out = pl.pallas_call(
        functools.partial(_classifier_kernel, lane_groups=k, group_dim=D),
        out_shape=jax.ShapeDtypeStruct((Bp, k), dtype),
        grid_spec=pltpu.PrefetchScalarGridSpec(
            num_scalar_prefetch=0,
            grid=(n_tiles,),
            in_specs=[
                pl.BlockSpec((Bt, Dp), lambda i: (i, 0)),            # x: batch-tiled
                pl.BlockSpec((1, Dp), lambda i: (0, 0)),             # w: resident row
                pl.BlockSpec(memory_space=pltpu.MemorySpace.SMEM),   # b: scalar
            ],
            out_specs=pl.BlockSpec((Bt, k), lambda i: (i, 0)),
        ),
        compiler_params=pltpu.CompilerParams(
            dimension_semantics=("parallel",),
            vmem_limit_bytes=vmem_limit,
        ),
        cost_estimate=pl.CostEstimate(
            flops=2 * B * D,
            transcendentals=B,
            bytes_accessed=elem * (B * D + D * k + B) + 4,
        ),
    )(x, w_row, b_s)

    return jnp.reshape(out, (B, 1))


if __name__ == "__main__":
    B, feature_dim = 20, 32  # small-D, non-multiple-of-8 batch

    key = jax.random.PRNGKey(0)
    kx, kw, kb = jax.random.split(key, 3)

    # nn.Linear(feature_dim, 1): weight stored transposed (D, 1), bias (1,)
    bound = 1.0 / (feature_dim ** 0.5)
    w = jax.random.uniform(kw, (feature_dim, 1), jnp.float32, -bound, bound)
    b = jax.random.uniform(kb, (1,), jnp.float32, -bound, bound)
    x = jax.random.normal(kx, (B, feature_dim), jnp.float32)

    ref = jax.nn.sigmoid(x @ w + b[None, :])

    # 1) default: lane-packed (D=32 -> k=4 rows per 128-lane group), single block.
    scores = classifier_forward(x, w, b)
    jax.block_until_ready(scores)
    assert scores.shape == (B, 1)
    assert jnp.allclose(scores, ref, atol=1e-5, rtol=1e-5)

    # 2) unpacked + forced small tile: multi-step grid with a ragged (masked)
    #    last block and no host-side padding of x.
    scores_tiled = classifier_forward(x, w, b, block_rows=8, pack_lanes=False)
    jax.block_until_ready(scores_tiled)
    assert scores_tiled.shape == (B, 1)
    assert jnp.allclose(scores_tiled, ref, atol=1e-5, rtol=1e-5)

    # 3) lane-packed + forced small tile: multi-tile packed path with ragged edge.
    B2 = 56
    x2 = jax.random.normal(kx, (B2, feature_dim), jnp.float32)
    ref2 = jax.nn.sigmoid(x2 @ w + b[None, :])
    scores2 = classifier_forward(x2, w, b, block_rows=8)
    jax.block_until_ready(scores2)
    assert scores2.shape == (B2, 1)
    assert jnp.allclose(scores2, ref2, atol=1e-5, rtol=1e-5)

    print("KERNEL_OK")
</pallas_src>

<mosaic_0001>
module attributes {stable_mosaic.version = 11 : i64} {
  func.func @_classifier_kernel(%arg0: i32, %arg1: memref<5x128xf32, #tpu.memory_space<vmem>>, %arg2: memref<1x128xf32, #tpu.memory_space<vmem>>, %arg3: memref<1xf32, #tpu.memory_space<smem>>, %arg4: memref<5x4xf32, #tpu.memory_space<vmem>>) attributes {dimension_semantics = [#tpu.dimension_semantics<parallel>], iteration_bounds = array<i64: 1>, scalar_prefetch = 0 : i64, scratch_operands = 0 : i64, tpu.core_type = #tpu.core_type<tc>, window_params = [{transform_indices = @transform_0, window_bounds = array<i64: 5, 128>}, {pipeline_mode = #tpu.pipeline_mode<synchronous>, transform_indices = @transform_1, window_bounds = array<i64: 1, 128>}, {transform_indices = @transform_2, window_bounds = array<i64: 1>}, {transform_indices = @transform_3, window_bounds = array<i64: 5, 4>}]} {
    %c0 = arith.constant 0 : index
    %c0_0 = arith.constant 0 : index
    %0 = vector.load %arg1[%c0, %c0_0] : memref<5x128xf32, #tpu.memory_space<vmem>>, vector<5x128xf32>
    %c0_1 = arith.constant 0 : index
    %c0_2 = arith.constant 0 : index
    %1 = vector.load %arg2[%c0_1, %c0_2] : memref<1x128xf32, #tpu.memory_space<vmem>>, vector<1x128xf32>
    %2 = vector.broadcast %1 : vector<1x128xf32> to vector<5x128xf32>
    %3 = arith.mulf %0, %2 : vector<5x128xf32>
    %4 = vector.extract_strided_slice %3 {offsets = [0, 0], sizes = [5, 32], strides = [1, 1]} : vector<5x128xf32> to vector<5x32xf32>
    %cst = arith.constant dense<0.000000e+00> : vector<5xf32>
    %5 = vector.multi_reduction <add>, %4, %cst [1] : vector<5x32xf32> to vector<5xf32>
    %6 = vector.shape_cast %5 : vector<5xf32> to vector<5x1xf32>
    %7 = vector.extract_strided_slice %3 {offsets = [0, 32], sizes = [5, 32], strides = [1, 1]} : vector<5x128xf32> to vector<5x32xf32>
    %cst_3 = arith.constant dense<0.000000e+00> : vector<5xf32>
    %8 = vector.multi_reduction <add>, %7, %cst_3 [1] : vector<5x32xf32> to vector<5xf32>
    %9 = vector.shape_cast %8 : vector<5xf32> to vector<5x1xf32>
    %10 = vector.extract_strided_slice %3 {offsets = [0, 64], sizes = [5, 32], strides = [1, 1]} : vector<5x128xf32> to vector<5x32xf32>
    %cst_4 = arith.constant dense<0.000000e+00> : vector<5xf32>
    %11 = vector.multi_reduction <add>, %10, %cst_4 [1] : vector<5x32xf32> to vector<5xf32>
    %12 = vector.shape_cast %11 : vector<5xf32> to vector<5x1xf32>
    %13 = vector.extract_strided_slice %3 {offsets = [0, 96], sizes = [5, 32], strides = [1, 1]} : vector<5x128xf32> to vector<5x32xf32>
    %cst_5 = arith.constant dense<0.000000e+00> : vector<5xf32>
    %14 = vector.multi_reduction <add>, %13, %cst_5 [1] : vector<5x32xf32> to vector<5xf32>
    %15 = vector.shape_cast %14 : vector<5xf32> to vector<5x1xf32>
    %16 = tpu.concatenate %6, %9, %12, %15 in 1 : vector<5x1xf32>, vector<5x1xf32>, vector<5x1xf32>, vector<5x1xf32> -> vector<5x4xf32>
    %c0_6 = arith.constant 0 : index
    %17 = memref.load %arg3[%c0_6] : memref<1xf32, #tpu.memory_space<smem>>
    %18 = vector.broadcast %17 : f32 to vector<5x4xf32>
    %19 = arith.addf %16, %18 : vector<5x4xf32>
    %20 = arith.negf %19 : vector<5x4xf32>
    %21 = math.exp %20 : vector<5x4xf32>
    %cst_7 = arith.constant 1.000000e+00 : f32
    %22 = vector.broadcast %cst_7 : f32 to vector<5x4xf32>
    %23 = arith.addf %22, %21 : vector<5x4xf32>
    %24 = arith.divf %22, %23 : vector<5x4xf32>
    %c0_8 = arith.constant 0 : index
    %c0_9 = arith.constant 0 : index
    %25 = vector.load %arg4[%c0_8, %c0_9] : memref<5x4xf32, #tpu.memory_space<vmem>>, vector<5x4xf32>
    tpu.vector_store %arg4[%c0_8, %c0_9], %24 {strides = array<i32>} : memref<5x4xf32, #tpu.memory_space<vmem>>, vector<5x4xf32>,
    return
  }
  func.func @transform_0(%arg0: i32) -> (i32, i32) {
    %c0_i32 = arith.constant 0 : i32
    %c0_i32_0 = arith.constant 0 : i32
    return %arg0, %c0_i32 : i32, i32
  }
  func.func @transform_1(%arg0: i32) -> (i32, i32) {
    %c0_i32 = arith.constant 0 : i32
    %c0_i32_0 = arith.constant 0 : i32
    %c0_i32_1 = arith.constant 0 : i32
    return %c0_i32, %c0_i32_0 : i32, i32
  }
  func.func @transform_2(%arg0: i32) -> i32 {
    %c0_i32 = arith.constant 0 : i32
    %c0_i32_0 = arith.constant 0 : i32
    return %c0_i32 : i32
  }
  func.func @transform_3(%arg0: i32) -> (i32, i32) {
    %c0_i32 = arith.constant 0 : i32
    %c0_i32_0 = arith.constant 0 : i32
    return %arg0, %c0_i32 : i32, i32
  }
}

</mosaic_0001>

<bundles_post_ra>
// kernel: tpu_custom_call.1
= control target key start
LH: loop header
LB: loop body
LE: loop exit
PB: predicated region body
PF: predicated region fallthrough
CT: control target
= control target key end

     0   :  { %9 = vsyncpa [#allocation4], 0  ;;  %s115_s12 = smov [#allocation3]   ;;  %s160_s0 = inlined_call_operand.hbm [shape: f32[5,128], index: 0, kind: input, shape index: {}]   ;;  %s161_s1 = inlined_call_operand.vmem [shape: f32[1,128], index: 1, kind: input, shape index: {}]   ;;  %s162_s2 = inlined_call_operand.<no memory space> [shape: f32[1], index: 2, kind: input, shape index: {}]   ;;  %s163_s3 = inlined_call_operand.vmem [shape: f32[5,4], index: 3, kind: output, shape index: {}]  }
   0x1   :  { %s16_s13 = sshll.u32 %s115_s12, 4  ;;  %s91_s16 = scalar_lea.hbm %s160_s0, 128  ;;  %s17_s13 = int_to_ptr.vmem [resolvable:$true] %s16_s13 }
   0x2   :  { %p92_p0 = scmp.ne.s32.totalorder %s160_s0, %s91_s16  ;;  %p95_p1 = scmp.lt.u32.totalorder %s91_s16, %s160_s0 }
   0x4   :  { %p97_p2 = pnand %p95_p1, %p92_p0 }
   0x6   :  { %100 = shalt.err (!%p97_p2)
}
   0x7   :  { %s101_s21 = scalar_lea.vmem %s17_s13, 128  ;;  %p106_p4 = scmp.lt.s32.totalorder %s17_s13, %s17_s13 }
   0x8   :  { %p102_p3 = scmp.ne.s32.totalorder %s17_s13, %s101_s21  ;;  %p107_p5 = scmp.lt.s32.totalorder %s101_s21, %s101_s21 }
   0xa   :  { %p108_p6 = por %p107_p5, %p106_p4 }
   0xc   :  { %p109_p7 = pnand %p108_p6, %p102_p3 }
   0xe   :  { %112 = shalt.err (!%p109_p7)
}
   0xf   :  { %19 = dma.hbm_to_vmem [thread:$0]  %s160_s0, 128, %s17_s13, [#allocation4]  }
  0x10   :  { %113 = dma.done.wait [#allocation4], 128  }
  0x11   :  { %114 = vsyncadd [#allocation4], 4294967168  ;;  %v27_v0 = vld [vmem:[#allocation3] sm:$0x1f]  ;;  %s116_s26 = smov 96   ;;  %s117_s27 = smov 32   ;;  %v66_v15 = vstv %s162_s2 }
  0x12   :  { %v81_v1 = vld [vmem:[%s161_s1] ss:$0 sm:$0xff]  ;;  %s118_s28 = smov 64   ;;  %vm36_vm0 = vcmask 258048   ;;  %vm59_vm1 = vcmask 7168   ;;  %vm61_vm2 = vcmask 15360  }
  0x13   :  { %v35_v2 = vmul.f32 %v81_v1, %v27_v0  ;;  %vm63_vm3 = vcmask 23552   ;;  %vm74_vm4 = vcmask 28672  }
  0x15   :  { %41 = vrot.lane.b32.xlu0 %v35_v2, %s116_s26  ;;  %53 = vrot.lane.b32.xlu1 %v35_v2, %s117_s27  ;;  %v37_v3 = vsel %vm36_vm0, %v35_v2, 0.0 }
  0x19   :  { %47 = vrot.lane.b32.xlu0 %v35_v2, %s118_s28 }
  0x39   :  { %38 = vadd.xlane.f32.xlu1 %v37_v3 }
  0x87   :  { %v42_v4 = vpop.permute.xlu0 %41  ;;  %v54_v5 = vpop.permute.xlu1 %53 }
  0x88   :  { %v44_v6 = vsel %vm36_vm0, %v42_v4, 0.0  ;;  %v56_v7 = vsel %vm36_vm0, %v54_v5, 0.0 }
  0x89   :  { %45 = vadd.xlane.f32.xlu0 %v44_v6  ;;  %57 = vadd.xlane.f32.xlu1 %v56_v7 }
  0x8b   :  { %v48_v8 = vpop.permute.xlu0 %47 }
  0x8c   :  { %v50_v9 = vsel %vm36_vm0, %v48_v8, 0.0 }
  0x8d   :  { %51 = vadd.xlane.f32.xlu0 %v50_v9 }
  0xc6   :  { %v39_v10 = vpop.xlane.xlu1 %38 }
 0x116   :  { %v46_v11 = vpop.xlane.xlu0 %45  ;;  %v58_v12 = vpop.xlane.xlu1 %57 }
 0x117   :  { %v60_v13 = vsel %vm59_vm1, %v39_v10, %v46_v11 }
 0x11a   :  { %v52_v14 = vpop.xlane.xlu0 %51 }
 0x11b   :  { %v62_v16 = vsel %vm61_vm2, %v60_v13, %v52_v14 }
 0x11c   :  { %v64_v17 = vsel %vm63_vm3, %v62_v16, %v58_v12 }
 0x11d   :  { %v67_v18 = vadd.f32 %v66_v15, %v64_v17 }
 0x11f   :  { %v82_v19 = vmul.f32 -1.442695, %v67_v18 }
 0x121   :  { %87 = vpow2.f32 %v82_v19 }
 0x12b   :  { %v88_v20 = vpop.eup %87 }
 0x12c   :  { %v71_v21 = vadd.f32 1.0, %v88_v20 }
 0x12e   :  { %89 = vrcp.f32 %v71_v21 }
 0x138   :  { %v90_v22 = vpop.eup %89 }
 0x139   :  { %75 = vst.msk [vmem:[%s163_s3] sm:$0x1f] %vm74_vm4, %v90_v22 }
 0x13a   :  { %80 = vsyncpa [#allocation4], 1 }

</bundles_post_ra>
